<compile_context>
chip_gen: v7x
topology: tpu7x:2x2x1
jax: 0.10.0
libtpu: 0.0.40
codegen_flags: <defaults>
</compile_context>

<pallas_src>
import jax
import jax.numpy as jnp
from jax.experimental import pallas as pl
from jax.experimental.pallas import tpu as pltpu

LN_EPS = 1e-5          # PyTorch nn.LayerNorm default eps
_LANE = 128
_SUBLANE = 8


def _round_up(n, m):
    return ((n + m - 1) // m) * m


def _layernorm_fused(h, gamma, beta, true_n):
    """Single-pass LayerNorm over the last axis.

    `h` may have zero-padded lanes beyond `true_n`; since those lanes are
    exactly 0 they contribute nothing to sum / sum-of-squares, so dividing by
    the true feature count gives exact statistics.  gamma is folded into the
    rsqrt scale so the normalize is one multiply-add per element; padded
    gamma/beta are 0 so padded lanes come out 0.
    """
    inv_n = 1.0 / float(true_n)
    s = jnp.sum(h, axis=-1, keepdims=True)
    ss = jnp.sum(h * h, axis=-1, keepdims=True)
    mean = s * inv_n
    var = ss * inv_n - mean * mean          # biased variance, like torch
    scale = jax.lax.rsqrt(var + LN_EPS) * gamma
    return (h - mean) * scale + beta


def _make_actor_kernel(fc1_dims, fc2_dims, compute_dtype):
    def kernel(x_ref,
               w1_ref, b1_ref, g1_ref, be1_ref,
               w2_ref, b2_ref, g2_ref, be2_ref,
               w3_ref, b3_ref,
               out_ref):
        x = x_ref[...].astype(compute_dtype)

        # fc1 + LayerNorm + ReLU  (MXU matmul, f32 accumulation)
        h = jnp.dot(x, w1_ref[...], preferred_element_type=jnp.float32) + b1_ref[...]
        h = _layernorm_fused(h, g1_ref[...], be1_ref[...], fc1_dims)
        h = jnp.maximum(h, 0.0)

        # fc2 + LayerNorm + ReLU
        h = jnp.dot(h.astype(compute_dtype), w2_ref[...],
                    preferred_element_type=jnp.float32) + b2_ref[...]
        h = _layernorm_fused(h, g2_ref[...], be2_ref[...], fc2_dims)
        h = jnp.maximum(h, 0.0)

        # mu + tanh  (lane-dense padded output; padded lanes are tanh(0)=0)
        h = jnp.dot(h.astype(compute_dtype), w3_ref[...],
                    preferred_element_type=jnp.float32) + b3_ref[...]
        out_ref[...] = jnp.tanh(h)
    return kernel


def actor_forward(x, params, *, block_batch=256, compute_dtype=jnp.float32):
    """x: (B, input_dim) float32 -> (B, n_actions) float32.

    compute_dtype=jnp.bfloat16 puts the three matmuls on the bf16 MXU path
    (v5e/v6e/v7x); accumulation and LN/ReLU/tanh stay f32.
    """
    (w1, b1, g1, be1, w2, b2, g2, be2, w3, b3) = params
    B, in_dim = x.shape
    fc1_dims = w1.shape[1]
    fc2_dims = w2.shape[1]
    n_actions = w3.shape[1]

    # Lane-dense padded widths.
    h1p = _round_up(fc1_dims, _LANE)
    h2p = _round_up(fc2_dims, _LANE)
    nap = _round_up(n_actions, _LANE)

    # Batch tile: multiple of the sublane width, capped by the requested tile.
    tb = min(block_batch, _round_up(B, _SUBLANE))
    b_pad = _round_up(_round_up(B, _SUBLANE), tb)

    def pad2(a, rows, cols, dtype=None):
        a = jnp.pad(a, ((0, rows - a.shape[0]), (0, cols - a.shape[1])))
        return a.astype(dtype) if dtype is not None else a

    # Zero padding keeps the math exact (see _layernorm_fused / kernel notes).
    x_p = pad2(x, b_pad, in_dim)
    w1p = pad2(w1, in_dim, h1p, compute_dtype)
    w2p = pad2(w2, h1p, h2p, compute_dtype)
    w3p = pad2(w3, h2p, nap, compute_dtype)
    b1p = pad2(b1, 1, h1p)
    b2p = pad2(b2, 1, h2p)
    b3p = pad2(b3, 1, nap)
    g1p = pad2(g1, 1, h1p)
    be1p = pad2(be1, 1, h1p)
    g2p = pad2(g2, 1, h2p)
    be2p = pad2(be2, 1, h2p)

    grid = (b_pad // tb,)

    def row_block(shape):
        # x / out tiles walk the batch axis; auto double-buffered by Pallas.
        return pl.BlockSpec(shape, lambda i: (i, 0))

    def resident(arr):
        # Constant block index -> stays VMEM-resident across grid iterations.
        return pl.BlockSpec(arr.shape, lambda i: (0, 0))

    in_specs = [
        row_block((tb, in_dim)),
        resident(w1p), resident(b1p), resident(g1p), resident(be1p),
        resident(w2p), resident(b2p), resident(g2p), resident(be2p),
        resident(w3p), resident(b3p),
    ]
    out_specs = row_block((tb, nap))

    weight_bytes = sum(
        int(a.size) * a.dtype.itemsize
        for a in (w1p, b1p, g1p, be1p, w2p, b2p, g2p, be2p, w3p, b3p))
    cost = pl.CostEstimate(
        flops=2 * b_pad * (in_dim * h1p + h1p * h2p + h2p * nap),
        transcendentals=b_pad * (2 + nap),          # 2 rsqrt/row + tanh/elem
        bytes_accessed=b_pad * (in_dim + nap) * 4 + weight_bytes,
    )

    out = pl.pallas_call(
        _make_actor_kernel(fc1_dims, fc2_dims, compute_dtype),
        out_shape=jax.ShapeDtypeStruct((b_pad, nap), jnp.float32),
        grid=grid,
        in_specs=in_specs,
        out_specs=out_specs,
        compiler_params=pltpu.CompilerParams(
            dimension_semantics=("parallel",),      # megacore-shardable batch
            vmem_limit_bytes=32 * 1024 * 1024,      # explicit; fits all gens
        ),
        cost_estimate=cost,
    )(x_p, w1p, b1p, g1p, be1p, w2p, b2p, g2p, be2p, w3p, b3p)

    return out[:B, :n_actions]


def init_params(key, input_dim, fc1_dims, fc2_dims, n_actions):
    """Deterministic init mirroring the module's uniform init ranges.

    PyTorch nn.Linear stores weight as (out, in); we store the transpose
    (in, out) so the kernel can do x @ W directly.
    """
    ks = jax.random.split(key, 6)
    f1 = 1.0 / jnp.sqrt(jnp.float32(fc1_dims))   # fc1.weight.size()[0] == fc1_dims
    f3 = 0.003

    w1 = jax.random.uniform(ks[0], (input_dim, fc1_dims), jnp.float32, -f1, f1)
    b1 = jax.random.uniform(ks[1], (1, fc1_dims), jnp.float32, -f1, f1)
    # fc2.weight gets re-initialized with (-f1, f1) in the reference __init__
    w2 = jax.random.uniform(ks[2], (fc1_dims, fc2_dims), jnp.float32, -f1, f1)
    # fc2.bias is never re-initialized in the reference; use PyTorch-default
    # bound 1/sqrt(in_features).
    b2_bound = 1.0 / jnp.sqrt(jnp.float32(fc1_dims))
    b2 = jax.random.uniform(ks[3], (1, fc2_dims), jnp.float32, -b2_bound, b2_bound)
    w3 = jax.random.uniform(ks[4], (fc2_dims, n_actions), jnp.float32, -f3, f3)
    b3 = jax.random.uniform(ks[5], (1, n_actions), jnp.float32, -f3, f3)

    # LayerNorm affine params: PyTorch defaults (ones / zeros)
    g1 = jnp.ones((1, fc1_dims), jnp.float32)
    be1 = jnp.zeros((1, fc1_dims), jnp.float32)
    g2 = jnp.ones((1, fc2_dims), jnp.float32)
    be2 = jnp.zeros((1, fc2_dims), jnp.float32)

    return (w1, b1, g1, be1, w2, b2, g2, be2, w3, b3)


def actor_forward_ref(x, params):
    """Pure-JAX reference matching the PyTorch forward (two-pass LN)."""
    (w1, b1, g1, be1, w2, b2, g2, be2, w3, b3) = params

    def ln(h, g, b):
        mean = jnp.mean(h, axis=-1, keepdims=True)
        var = jnp.mean((h - mean) ** 2, axis=-1, keepdims=True)  # biased
        return (h - mean) * jax.lax.rsqrt(var + LN_EPS) * g + b

    h = jnp.maximum(ln(x @ w1 + b1, g1, be1), 0.0)
    h = jnp.maximum(ln(h @ w2 + b2, g2, be2), 0.0)
    return jnp.tanh(h @ w3 + b3)


if __name__ == "__main__":
    # Small shapes consistent with the module's forward.
    batch = 8
    input_dim = 16     # input_dims = (16,)
    fc1_dims = 64
    fc2_dims = 32
    n_actions = 4

    key = jax.random.PRNGKey(0)
    k_x, k_p = jax.random.split(key)
    x = jax.random.normal(k_x, (batch, input_dim), jnp.float32)
    params = init_params(k_p, input_dim, fc1_dims, fc2_dims, n_actions)

    ref = actor_forward_ref(x, params)

    # f32 path (bit-for-bit-ish vs the reference).
    out = jax.block_until_ready(actor_forward(x, params))
    assert out.shape == (batch, n_actions)
    assert jnp.allclose(out, ref, atol=1e-4, rtol=1e-4)

    # bf16-operand MXU path (v5e/v6e/v7x fast path); f32 accumulation,
    # f32 LayerNorm/ReLU/tanh -> looser tolerance vs the f32 reference.
    out_bf16 = jax.block_until_ready(
        actor_forward(x, params, compute_dtype=jnp.bfloat16))
    assert out_bf16.shape == (batch, n_actions)
    assert jnp.allclose(out_bf16, ref, atol=5e-2, rtol=5e-2)

    print("KERNEL_OK")
</pallas_src>

<mosaic_0001>
module attributes {stable_mosaic.version = 11 : i64} {
  func.func @kernel(%arg0: i32, %arg1: memref<8x16xf32, #tpu.memory_space<vmem>>, %arg2: memref<16x128xf32, #tpu.memory_space<vmem>>, %arg3: memref<1x128xf32, #tpu.memory_space<vmem>>, %arg4: memref<1x128xf32, #tpu.memory_space<vmem>>, %arg5: memref<1x128xf32, #tpu.memory_space<vmem>>, %arg6: memref<128x128xf32, #tpu.memory_space<vmem>>, %arg7: memref<1x128xf32, #tpu.memory_space<vmem>>, %arg8: memref<1x128xf32, #tpu.memory_space<vmem>>, %arg9: memref<1x128xf32, #tpu.memory_space<vmem>>, %arg10: memref<128x128xf32, #tpu.memory_space<vmem>>, %arg11: memref<1x128xf32, #tpu.memory_space<vmem>>, %arg12: memref<8x128xf32, #tpu.memory_space<vmem>>) attributes {dimension_semantics = [#tpu.dimension_semantics<parallel>], iteration_bounds = array<i64: 1>, scalar_prefetch = 0 : i64, scratch_operands = 0 : i64, tpu.core_type = #tpu.core_type<tc>, window_params = [{transform_indices = @transform_0, window_bounds = array<i64: 8, 16>}, {pipeline_mode = #tpu.pipeline_mode<synchronous>, transform_indices = @transform_1, window_bounds = array<i64: 16, 128>}, {pipeline_mode = #tpu.pipeline_mode<synchronous>, transform_indices = @transform_2, window_bounds = array<i64: 1, 128>}, {pipeline_mode = #tpu.pipeline_mode<synchronous>, transform_indices = @transform_3, window_bounds = array<i64: 1, 128>}, {pipeline_mode = #tpu.pipeline_mode<synchronous>, transform_indices = @transform_4, window_bounds = array<i64: 1, 128>}, {pipeline_mode = #tpu.pipeline_mode<synchronous>, transform_indices = @transform_5, window_bounds = array<i64: 128, 128>}, {pipeline_mode = #tpu.pipeline_mode<synchronous>, transform_indices = @transform_6, window_bounds = array<i64: 1, 128>}, {pipeline_mode = #tpu.pipeline_mode<synchronous>, transform_indices = @transform_7, window_bounds = array<i64: 1, 128>}, {pipeline_mode = #tpu.pipeline_mode<synchronous>, transform_indices = @transform_8, window_bounds = array<i64: 1, 128>}, {pipeline_mode = #tpu.pipeline_mode<synchronous>, transform_indices = @transform_9, window_bounds = array<i64: 128, 128>}, {pipeline_mode = #tpu.pipeline_mode<synchronous>, transform_indices = @transform_10, window_bounds = array<i64: 1, 128>}, {transform_indices = @transform_11, window_bounds = array<i64: 8, 128>}]} {
    %c0 = arith.constant 0 : index
    %c0_0 = arith.constant 0 : index
    %0 = vector.load %arg1[%c0, %c0_0] : memref<8x16xf32, #tpu.memory_space<vmem>>, vector<8x16xf32>
    %c0_1 = arith.constant 0 : index
    %c0_2 = arith.constant 0 : index
    %1 = vector.load %arg2[%c0_1, %c0_2] : memref<16x128xf32, #tpu.memory_space<vmem>>, vector<16x128xf32>
    %cst = arith.constant dense<0.000000e+00> : vector<8x128xf32>
    %2 = tpu.matmul %0, %1, %cst {dimension_numbers = #tpu.dot_dimension_numbers<[1], [0], [0], [1], [0, 0, 1, 1], [], []>} : vector<8x16xf32>, vector<16x128xf32>, vector<8x128xf32> -> vector<8x128xf32>
    %c0_3 = arith.constant 0 : index
    %c0_4 = arith.constant 0 : index
    %3 = vector.load %arg3[%c0_3, %c0_4] : memref<1x128xf32, #tpu.memory_space<vmem>>, vector<1x128xf32>
    %4 = vector.broadcast %3 : vector<1x128xf32> to vector<8x128xf32>
    %5 = arith.addf %2, %4 : vector<8x128xf32>
    %c0_5 = arith.constant 0 : index
    %c0_6 = arith.constant 0 : index
    %6 = vector.load %arg4[%c0_5, %c0_6] : memref<1x128xf32, #tpu.memory_space<vmem>>, vector<1x128xf32>
    %c0_7 = arith.constant 0 : index
    %c0_8 = arith.constant 0 : index
    %7 = vector.load %arg5[%c0_7, %c0_8] : memref<1x128xf32, #tpu.memory_space<vmem>>, vector<1x128xf32>
    %cst_9 = arith.constant dense<0.000000e+00> : vector<8xf32>
    %8 = vector.multi_reduction <add>, %5, %cst_9 [1] : vector<8x128xf32> to vector<8xf32>
    %9 = vector.shape_cast %8 : vector<8xf32> to vector<8x1xf32>
    %10 = arith.mulf %5, %5 : vector<8x128xf32>
    %cst_10 = arith.constant dense<0.000000e+00> : vector<8xf32>
    %11 = vector.multi_reduction <add>, %10, %cst_10 [1] : vector<8x128xf32> to vector<8xf32>
    %12 = vector.shape_cast %11 : vector<8xf32> to vector<8x1xf32>
    %cst_11 = arith.constant 1.562500e-02 : f32
    %13 = vector.broadcast %cst_11 : f32 to vector<8x1xf32>
    %14 = arith.mulf %9, %13 : vector<8x1xf32>
    %cst_12 = arith.constant 1.562500e-02 : f32
    %15 = vector.broadcast %cst_12 : f32 to vector<8x1xf32>
    %16 = arith.mulf %12, %15 : vector<8x1xf32>
    %17 = arith.mulf %14, %14 : vector<8x1xf32>
    %18 = arith.subf %16, %17 : vector<8x1xf32>
    %cst_13 = arith.constant 9.99999974E-6 : f32
    %19 = vector.broadcast %cst_13 : f32 to vector<8x1xf32>
    %20 = arith.addf %18, %19 : vector<8x1xf32>
    %21 = math.rsqrt %20 : vector<8x1xf32>
    %22 = vector.broadcast %21 : vector<8x1xf32> to vector<8x128xf32>
    %23 = vector.broadcast %6 : vector<1x128xf32> to vector<8x128xf32>
    %24 = arith.mulf %22, %23 : vector<8x128xf32>
    %25 = vector.broadcast %14 : vector<8x1xf32> to vector<8x128xf32>
    %26 = arith.subf %5, %25 : vector<8x128xf32>
    %27 = arith.mulf %26, %24 : vector<8x128xf32>
    %28 = vector.broadcast %7 : vector<1x128xf32> to vector<8x128xf32>
    %29 = arith.addf %27, %28 : vector<8x128xf32>
    %cst_14 = arith.constant 0.000000e+00 : f32
    %30 = vector.broadcast %cst_14 : f32 to vector<8x128xf32>
    %31 = arith.maximumf %29, %30 : vector<8x128xf32>
    %c0_15 = arith.constant 0 : index
    %c0_16 = arith.constant 0 : index
    %32 = vector.load %arg6[%c0_15, %c0_16] : memref<128x128xf32, #tpu.memory_space<vmem>>, vector<128x128xf32>
    %cst_17 = arith.constant dense<0.000000e+00> : vector<8x128xf32>
    %33 = tpu.matmul %31, %32, %cst_17 {dimension_numbers = #tpu.dot_dimension_numbers<[1], [0], [0], [1], [0, 0, 1, 1], [], []>} : vector<8x128xf32>, vector<128x128xf32>, vector<8x128xf32> -> vector<8x128xf32>
    %c0_18 = arith.constant 0 : index
    %c0_19 = arith.constant 0 : index
    %34 = vector.load %arg7[%c0_18, %c0_19] : memref<1x128xf32, #tpu.memory_space<vmem>>, vector<1x128xf32>
    %35 = vector.broadcast %34 : vector<1x128xf32> to vector<8x128xf32>
    %36 = arith.addf %33, %35 : vector<8x128xf32>
    %c0_20 = arith.constant 0 : index
    %c0_21 = arith.constant 0 : index
    %37 = vector.load %arg8[%c0_20, %c0_21] : memref<1x128xf32, #tpu.memory_space<vmem>>, vector<1x128xf32>
    %c0_22 = arith.constant 0 : index
    %c0_23 = arith.constant 0 : index
    %38 = vector.load %arg9[%c0_22, %c0_23] : memref<1x128xf32, #tpu.memory_space<vmem>>, vector<1x128xf32>
    %cst_24 = arith.constant dense<0.000000e+00> : vector<8xf32>
    %39 = vector.multi_reduction <add>, %36, %cst_24 [1] : vector<8x128xf32> to vector<8xf32>
    %40 = vector.shape_cast %39 : vector<8xf32> to vector<8x1xf32>
    %41 = arith.mulf %36, %36 : vector<8x128xf32>
    %cst_25 = arith.constant dense<0.000000e+00> : vector<8xf32>
    %42 = vector.multi_reduction <add>, %41, %cst_25 [1] : vector<8x128xf32> to vector<8xf32>
    %43 = vector.shape_cast %42 : vector<8xf32> to vector<8x1xf32>
    %cst_26 = arith.constant 3.125000e-02 : f32
    %44 = vector.broadcast %cst_26 : f32 to vector<8x1xf32>
    %45 = arith.mulf %40, %44 : vector<8x1xf32>
    %cst_27 = arith.constant 3.125000e-02 : f32
    %46 = vector.broadcast %cst_27 : f32 to vector<8x1xf32>
    %47 = arith.mulf %43, %46 : vector<8x1xf32>
    %48 = arith.mulf %45, %45 : vector<8x1xf32>
    %49 = arith.subf %47, %48 : vector<8x1xf32>
    %cst_28 = arith.constant 9.99999974E-6 : f32
    %50 = vector.broadcast %cst_28 : f32 to vector<8x1xf32>
    %51 = arith.addf %49, %50 : vector<8x1xf32>
    %52 = math.rsqrt %51 : vector<8x1xf32>
    %53 = vector.broadcast %52 : vector<8x1xf32> to vector<8x128xf32>
    %54 = vector.broadcast %37 : vector<1x128xf32> to vector<8x128xf32>
    %55 = arith.mulf %53, %54 : vector<8x128xf32>
    %56 = vector.broadcast %45 : vector<8x1xf32> to vector<8x128xf32>
    %57 = arith.subf %36, %56 : vector<8x128xf32>
    %58 = arith.mulf %57, %55 : vector<8x128xf32>
    %59 = vector.broadcast %38 : vector<1x128xf32> to vector<8x128xf32>
    %60 = arith.addf %58, %59 : vector<8x128xf32>
    %cst_29 = arith.constant 0.000000e+00 : f32
    %61 = vector.broadcast %cst_29 : f32 to vector<8x128xf32>
    %62 = arith.maximumf %60, %61 : vector<8x128xf32>
    %c0_30 = arith.constant 0 : index
    %c0_31 = arith.constant 0 : index
    %63 = vector.load %arg10[%c0_30, %c0_31] : memref<128x128xf32, #tpu.memory_space<vmem>>, vector<128x128xf32>
    %cst_32 = arith.constant dense<0.000000e+00> : vector<8x128xf32>
    %64 = tpu.matmul %62, %63, %cst_32 {dimension_numbers = #tpu.dot_dimension_numbers<[1], [0], [0], [1], [0, 0, 1, 1], [], []>} : vector<8x128xf32>, vector<128x128xf32>, vector<8x128xf32> -> vector<8x128xf32>
    %c0_33 = arith.constant 0 : index
    %c0_34 = arith.constant 0 : index
    %65 = vector.load %arg11[%c0_33, %c0_34] : memref<1x128xf32, #tpu.memory_space<vmem>>, vector<1x128xf32>
    %66 = vector.broadcast %65 : vector<1x128xf32> to vector<8x128xf32>
    %67 = arith.addf %64, %66 : vector<8x128xf32>
    %68 = math.tanh %67 : vector<8x128xf32>
    %c0_35 = arith.constant 0 : index
    %c0_36 = arith.constant 0 : index
    %69 = vector.load %arg12[%c0_35, %c0_36] : memref<8x128xf32, #tpu.memory_space<vmem>>, vector<8x128xf32>
    tpu.vector_store %arg12[%c0_35, %c0_36], %68 {strides = array<i32>} : memref<8x128xf32, #tpu.memory_space<vmem>>, vector<8x128xf32>,
    return
  }
  func.func @transform_0(%arg0: i32) -> (i32, i32) {
    %c0_i32 = arith.constant 0 : i32
    %c0_i32_0 = arith.constant 0 : i32
    return %arg0, %c0_i32 : i32, i32
  }
  func.func @transform_1(%arg0: i32) -> (i32, i32) {
    %c0_i32 = arith.constant 0 : i32
    %c0_i32_0 = arith.constant 0 : i32
    %c0_i32_1 = arith.constant 0 : i32
    return %c0_i32, %c0_i32_0 : i32, i32
  }
  func.func @transform_2(%arg0: i32) -> (i32, i32) {
    %c0_i32 = arith.constant 0 : i32
    %c0_i32_0 = arith.constant 0 : i32
    %c0_i32_1 = arith.constant 0 : i32
    return %c0_i32, %c0_i32_0 : i32, i32
  }
  func.func @transform_3(%arg0: i32) -> (i32, i32) {
    %c0_i32 = arith.constant 0 : i32
    %c0_i32_0 = arith.constant 0 : i32
    %c0_i32_1 = arith.constant 0 : i32
    return %c0_i32, %c0_i32_0 : i32, i32
  }
  func.func @transform_4(%arg0: i32) -> (i32, i32) {
    %c0_i32 = arith.constant 0 : i32
    %c0_i32_0 = arith.constant 0 : i32
    %c0_i32_1 = arith.constant 0 : i32
    return %c0_i32, %c0_i32_0 : i32, i32
  }
  func.func @transform_5(%arg0: i32) -> (i32, i32) {
    %c0_i32 = arith.constant 0 : i32
    %c0_i32_0 = arith.constant 0 : i32
    %c0_i32_1 = arith.constant 0 : i32
    return %c0_i32, %c0_i32_0 : i32, i32
  }
  func.func @transform_6(%arg0: i32) -> (i32, i32) {
    %c0_i32 = arith.constant 0 : i32
    %c0_i32_0 = arith.constant 0 : i32
    %c0_i32_1 = arith.constant 0 : i32
    return %c0_i32, %c0_i32_0 : i32, i32
  }
  func.func @transform_7(%arg0: i32) -> (i32, i32) {
    %c0_i32 = arith.constant 0 : i32
    %c0_i32_0 = arith.constant 0 : i32
    %c0_i32_1 = arith.constant 0 : i32
    return %c0_i32, %c0_i32_0 : i32, i32
  }
  func.func @transform_8(%arg0: i32) -> (i32, i32) {
    %c0_i32 = arith.constant 0 : i32
    %c0_i32_0 = arith.constant 0 : i32
    %c0_i32_1 = arith.constant 0 : i32
    return %c0_i32, %c0_i32_0 : i32, i32
  }
  func.func @transform_9(%arg0: i32) -> (i32, i32) {
    %c0_i32 = arith.constant 0 : i32
    %c0_i32_0 = arith.constant 0 : i32
    %c0_i32_1 = arith.constant 0 : i32
    return %c0_i32, %c0_i32_0 : i32, i32
  }
  func.func @transform_10(%arg0: i32) -> (i32, i32) {
    %c0_i32 = arith.constant 0 : i32
    %c0_i32_0 = arith.constant 0 : i32
    %c0_i32_1 = arith.constant 0 : i32
    return %c0_i32, %c0_i32_0 : i32, i32
  }
  func.func @transform_11(%arg0: i32) -> (i32, i32) {
    %c0_i32 = arith.constant 0 : i32
    %c0_i32_0 = arith.constant 0 : i32
    return %arg0, %c0_i32 : i32, i32
  }
}

</mosaic_0001>

<bundles_post_ra>
// kernel: tpu_custom_call.1
= control target key start
LH: loop header
LB: loop body
LE: loop exit
PB: predicated region body
PF: predicated region fallthrough
CT: control target
= control target key end

     0   :  { %16 = vsyncpa [#allocation3], 0  ;;  %s925_s0 = inlined_call_operand.hbm [shape: f32[8,16], index: 0, kind: input, shape index: {}]   ;;  %s926_s1 = inlined_call_operand.hbm [shape: f32[16,128], index: 1, kind: input, shape index: {}]   ;;  %s927_s2 = inlined_call_operand.vmem [shape: f32[1,128], index: 2, kind: input, shape index: {}]   ;;  %s928_s3 = inlined_call_operand.vmem [shape: f32[1,128], index: 3, kind: input, shape index: {}]   ;;  %s929_s4 = inlined_call_operand.vmem [shape: f32[1,128], index: 4, kind: input, shape index: {}]   ;;  %s930_s5 = inlined_call_operand.hbm [shape: f32[128,128], index: 5, kind: input, shape index: {}]   ;;  %s931_s6 = inlined_call_operand.vmem [shape: f32[1,128], index: 6, kind: input, shape index: {}]   ;;  %s932_s7 = inlined_call_operand.vmem [shape: f32[1,128], index: 7, kind: input, shape index: {}]   ;;  %s933_s8 = inlined_call_operand.vmem [shape: f32[1,128], index: 8, kind: input, shape index: {}]   ;;  %s934_s9 = inlined_call_operand.hbm [shape: f32[128,128], index: 9, kind: input, shape index: {}]   ;;  %s935_s10 = inlined_call_operand.vmem [shape: f32[1,128], index: 10, kind: input, shape index: {}]   ;;  %s936_s11 = inlined_call_operand.hbm [shape: f32[8,128], index: 11, kind: output, shape index: {}]  }
   0x1   :  { %17 = vsyncpa [#allocation6], 0 }
   0x2   :  { %18 = vsyncpa [#allocation9], 0 }
   0x3   :  { %19 = vsyncpa [#allocation4], 0  ;;  %s748_s17 = smov [#allocation5]   ;;  %s630_s21 = scalar_lea.hbm %s926_s1, 256 }
   0x4   :  { %s35_s18 = sshll.u32 %s748_s17, 4  ;;  %p631_p0 = scmp.ne.s32.totalorder %s926_s1, %s630_s21  ;;  %s36_s18 = int_to_ptr.vmem [resolvable:$true] %s35_s18 }
   0x5   :  { %p634_p1 = scmp.lt.u32.totalorder %s630_s21, %s926_s1 }
   0x7   :  { %p636_p2 = pnand %p634_p1, %p631_p0 }
   0x9   :  { %639 = shalt.err (!%p636_p2)
}
   0xa   :  { %s640_s26 = scalar_lea.vmem %s36_s18, 256  ;;  %p645_p4 = scmp.lt.s32.totalorder %s36_s18, %s36_s18 }
   0xb   :  { %p641_p3 = scmp.ne.s32.totalorder %s36_s18, %s640_s26  ;;  %p646_p5 = scmp.lt.s32.totalorder %s640_s26, %s640_s26 }
   0xd   :  { %p647_p6 = por %p646_p5, %p645_p4 }
   0xf   :  { %p648_p7 = pnand %p647_p6, %p641_p3 }
  0x11   :  { %651 = shalt.err (!%p648_p7)
}
  0x12   :  { %s749_s27 = smov 128   ;;  %s750_s28 = smov 8  }
  0x13   :  { %41 = dma.hbm_to_vmem [thread:$0]  %s926_s1, 256, %s36_s18, [#allocation6], %s749_s27, %s749_s27, %s750_s28  }
  0x14   :  { %s751_s12 = smov [#allocation2]   ;;  %s752_s14 = smov [#allocation7]  }
  0x15   :  { %s26_s13 = sshll.u32 %s751_s12, 4  ;;  %s53_s15 = sshll.u32 %s752_s14, 4  ;;  %s27_s13 = int_to_ptr.vmem [resolvable:$true] %s26_s13  ;;  %s54_s15 = int_to_ptr.vmem [resolvable:$true] %s53_s15 }
  0x16   :  { %s652_s19 = scalar_lea.hbm %s925_s0, 128 }
  0x17   :  { %p653_p8 = scmp.ne.s32.totalorder %s925_s0, %s652_s19  ;;  %p656_p9 = scmp.lt.u32.totalorder %s652_s19, %s925_s0 }
  0x19   :  { %p658_p10 = pnand %p656_p9, %p653_p8 }
  0x1b   :  { %661 = shalt.err (!%p658_p10)
}
  0x1c   :  { %s662_s1 = scalar_lea.vmem %s27_s13, 128  ;;  %p667_p12 = scmp.lt.s32.totalorder %s27_s13, %s27_s13 }
  0x1d   :  { %p663_p11 = scmp.ne.s32.totalorder %s27_s13, %s662_s1  ;;  %p668_p13 = scmp.lt.s32.totalorder %s662_s1, %s662_s1 }
  0x1f   :  { %p669_p0 = por %p668_p13, %p667_p12 }
  0x21   :  { %p670_p1 = pnand %p669_p0, %p663_p11 }
  0x23   :  { %673 = shalt.err (!%p670_p1)
}
  0x24   :  { %29 = dma.hbm_to_vmem [thread:$0]  %s925_s0, 128, %s27_s13, [#allocation3]  }
  0x25   :  { %s674_s29 = scalar_lea.hbm %s930_s5, 2048 }
  0x26   :  { %p675_p2 = scmp.ne.s32.totalorder %s930_s5, %s674_s29  ;;  %p678_p3 = scmp.lt.u32.totalorder %s674_s29, %s930_s5 }
  0x28   :  { %p680_p4 = pnand %p678_p3, %p675_p2 }
  0x2a   :  { %683 = shalt.err (!%p680_p4)
}
  0x2b   :  { %s684_s17 = scalar_lea.vmem %s54_s15, 2048  ;;  %p689_p6 = scmp.lt.s32.totalorder %s54_s15, %s54_s15 }
  0x2c   :  { %p685_p5 = scmp.ne.s32.totalorder %s54_s15, %s684_s17  ;;  %p690_p7 = scmp.lt.s32.totalorder %s684_s17, %s684_s17 }
  0x2e   :  { %p691_p8 = por %p690_p7, %p689_p6 }
  0x30   :  { %p692_p9 = pnand %p691_p8, %p685_p5 }
  0x32   :  { %695 = shalt.err (!%p692_p9)
}
  0x33   :  { %59 = dma.hbm_to_vmem [thread:$0]  %s930_s5, 2048, %s54_s15, [#allocation6], %s749_s27, %s749_s27, %s750_s28  }
  0x34   :  { %s753_s19 = smov [#allocation8]   ;;  %s696_s23 = scalar_lea.hbm %s934_s9, 2048 }
  0x35   :  { %s71_s20 = sshll.u32 %s753_s19, 4  ;;  %p697_p10 = scmp.ne.s32.totalorder %s934_s9, %s696_s23  ;;  %s72_s20 = int_to_ptr.vmem [resolvable:$true] %s71_s20 }
  0x36   :  { %p700_p11 = scmp.lt.u32.totalorder %s696_s23, %s934_s9 }
  0x38   :  { %p702_p12 = pnand %p700_p11, %p697_p10 }
  0x3a   :  { %705 = shalt.err (!%p702_p12)
}
  0x3b   :  { %s706_s26 = scalar_lea.vmem %s72_s20, 2048  ;;  %p711_p0 = scmp.lt.s32.totalorder %s72_s20, %s72_s20 }
  0x3c   :  { %p707_p13 = scmp.ne.s32.totalorder %s72_s20, %s706_s26  ;;  %p712_p1 = scmp.lt.s32.totalorder %s706_s26, %s706_s26 }
  0x3e   :  { %p713_p2 = por %p712_p1, %p711_p0 }
  0x40   :  { %p714_p3 = pnand %p713_p2, %p707_p13 }
  0x42   :  { %717 = shalt.err (!%p714_p3)
}
  0x43   :  { %77 = dma.hbm_to_vmem [thread:$0]  %s934_s9, 2048, %s72_s20, [#allocation9], %s749_s27, %s749_s27, %s750_s28  }
  0x44   :  { %740 = dma.done.wait [#allocation3], 128  }
  0x45   :  { %741 = vsyncadd [#allocation3], 4294967168 }
  0x46   :  { %742 = dma.done.wait [#allocation6], 2304  }
  0x47   :  { %743 = vsyncadd [#allocation6], 4294964992 }
  0x48   :  { %744 = dma.done.wait [#allocation9], 2048  }
  0x49   :  { %745 = vsyncadd [#allocation9], 4294965248  ;;  %v754_v0 = vmov 0.0|0.0   ;;  %vm755_vm0 = vmmov 0   ;;  %v756_v1 = vmov 0.0   ;;  %v93_v2 = vld [vmem:[#allocation5] sm:$0xff] }
  0x4a   :  { %563 = vmatprep.subr.bf16.mxu0 %v754_v0  ;;  %490 = vmatprep.mubr.msk.f32.mxu0 %vm755_vm0, %v756_v1  ;;  %v94_v3 = vld [vmem:[#allocation5 + $0x8] sm:$0xff]  ;;  %v92_v5 = vld [vmem:[#allocation2] sm:$0xff]  ;;  %vm102_vm1 = vcmask 130048   ;;  %v206_v6 = vld [vmem:[#allocation7] sm:$0xff] }
  0x4b   :  { %566 = vmatprep.subr.bf16.mxu1 %v754_v0  ;;  %525 = vmatprep.mubr.msk.f32.mxu1 %vm755_vm0, %v756_v1  ;;  %v564_v4 = vpack.c.bf16 %v94_v3, %v93_v2  ;;  %v207_v7 = vld [vmem:[#allocation7 + $0x8] sm:$0xff]  ;;  %v208_v14 = vld [vmem:[#allocation7 + $0x10] sm:$0xff]  ;;  %v209_v15 = vld [vmem:[#allocation7 + $0x18] sm:$0xff] }
  0x4c   :  { %v567_v8 = vpack.c.bf16 %v207_v7, %v206_v6  ;;  %v441_v9 = vld [vmem:[%s927_s2] ss:$0 sm:$0xff]  ;;  %v570_v16 = vpack.c.bf16 %v209_v15, %v208_v14  ;;  %v210_v17 = vld [vmem:[#allocation7 + $0x20] sm:$0xff]  ;;  %v212_v20 = vld [vmem:[#allocation7 + $0x30] sm:$0xff] }
  0x4d   :  { %565 = vmatpush3.bf16.msra.mxu0 %v564_v4  ;;  %v211_v18 = vld [vmem:[#allocation7 + $0x28] sm:$0xff]  ;;  %v213_v21 = vld [vmem:[#allocation7 + $0x38] sm:$0xff]  ;;  %v214_v23 = vld [vmem:[#allocation7 + $0x40] sm:$0xff] }
  0x4e   :  { %590 = vmatprep.subr.bf16.mxu0 %v754_v0  ;;  %568 = vmatpush3.bf16.msra.mxu1 %v567_v8  ;;  %v573_v19 = vpack.c.bf16 %v211_v18, %v210_v17  ;;  %v576_v22 = vpack.c.bf16 %v213_v21, %v212_v20  ;;  %v215_v24 = vld [vmem:[#allocation7 + $0x48] sm:$0xff]  ;;  %v216_v26 = vld [vmem:[#allocation7 + $0x50] sm:$0xff]  ;;  %v217_v27 = vld [vmem:[#allocation7 + $0x58] sm:$0xff] }
  0x4f   :  { %569 = vmatprep.subr.bf16.mxu1 %v754_v0  ;;  %v579_v25 = vpack.c.bf16 %v215_v24, %v214_v23  ;;  %v582_v28 = vpack.c.bf16 %v217_v27, %v216_v26  ;;  %v218_v29 = vld [vmem:[#allocation7 + $0x60] sm:$0xff]  ;;  %v219_v30 = vld [vmem:[#allocation7 + $0x68] sm:$0xff]  ;;  %v220_v32 = vld [vmem:[#allocation7 + $0x70] sm:$0xff] }
  0x50   :  { %491 = vmatmul.mubr.msk.f32.vlgmr.msra.gmra.mrb[0].mxu0 %vm102_vm1, %v92_v5  ;;  %v585_v31 = vpack.c.bf16 %v219_v30, %v218_v29  ;;  %v221_v33 = vld [vmem:[#allocation7 + $0x78] sm:$0xff]  ;;  %v443_v42 = vld [vmem:[%s928_s3] ss:$0 sm:$0xff]  ;;  %v329_v50 = vld [vmem:[#allocation8] sm:$0xff] }
  0x51   :  { %560 = vmatprep.mubr.msk.f32.mxu0 %vm755_vm0, %v756_v1  ;;  %v588_v34 = vpack.c.bf16 %v221_v33, %v220_v32  ;;  %v444_v46 = vld [vmem:[%s929_s4] ss:$0 sm:$0xff]  ;;  %v331_v58 = vld [vmem:[#allocation8 + $0x10] sm:$0xff]  ;;  %v332_v59 = vld [vmem:[#allocation8 + $0x18] sm:$0xff] }
  0x52   :  { %571 = vmatpush3.bf16.msra.mxu1 %v570_v16  ;;  %v330_v51 = vld [vmem:[#allocation8 + $0x8] sm:$0xff]  ;;  %v594_v60 = vpack.c.bf16 %v332_v59, %v331_v58  ;;  %v333_v61 = vld [vmem:[#allocation8 + $0x20] sm:$0xff]  ;;  %v335_v1 = vld [vmem:[#allocation8 + $0x30] sm:$0xff] }
  0x53   :  { %572 = vmatprep.subr.bf16.mxu1 %v754_v0  ;;  %v591_v52 = vpack.c.bf16 %v330_v51, %v329_v50  ;;  %v445_v53 = vld [vmem:[%s931_s6] ss:$0 sm:$0xff]  ;;  %v336_v2 = vld [vmem:[#allocation8 + $0x38] sm:$0xff]  ;;  %v337_v4 = vld [vmem:[#allocation8 + $0x40] sm:$0xff] }
  0x54   :  { %v334_v62 = vld [vmem:[#allocation8 + $0x28] sm:$0xff]  ;;  %v600_v3 = vpack.c.bf16 %v336_v2, %v335_v1  ;;  %v339_v7 = vld [vmem:[#allocation8 + $0x50] sm:$0xff]  ;;  %v340_v8 = vld [vmem:[#allocation8 + $0x58] sm:$0xff] }
  0x55   :  { %592 = vmatpush3.bf16.msra.mxu0 %v591_v52  ;;  %v597_v63 = vpack.c.bf16 %v334_v62, %v333_v61  ;;  %v338_v5 = vld [vmem:[#allocation8 + $0x48] sm:$0xff]  ;;  %v344_v14 = vld [vmem:[#allocation8 + $0x78] sm:$0xff] }
  0x56   :  { %574 = vmatpush3.bf16.msra.mxu1 %v573_v19  ;;  %593 = vmatprep.subr.bf16.mxu0 %v754_v0  ;;  %v603_v6 = vpack.c.bf16 %v338_v5, %v337_v4  ;;  %v446_v23 = vld [vmem:[%s932_s7] ss:$0 sm:$0xff]  ;;  %s757_s7 = smov [#allocation10]  }
  0x57   :  { %575 = vmatprep.subr.bf16.mxu1 %v754_v0  ;;  %v448_v30 = vld [vmem:[%s935_s10] ss:$0 sm:$0xff]  ;;  %s430_s13 = sshll.u32 %s757_s7, 4  ;;  %s431_s13 = int_to_ptr.vmem [resolvable:$true] %s430_s13 }
  0x58   :  { %s718_s19 = scalar_lea.vmem %s431_s13, 128  ;;  %p723_p5 = scmp.lt.s32.totalorder %s431_s13, %s431_s13 }
  0x59   :  { %595 = vmatpush3.bf16.msra.mxu0 %v594_v60  ;;  %p719_p4 = scmp.ne.s32.totalorder %s431_s13, %s718_s19  ;;  %p724_p6 = scmp.lt.s32.totalorder %s718_s19, %s718_s19 }
  0x5a   :  { %577 = vmatpush3.bf16.msra.mxu1 %v576_v22  ;;  %596 = vmatprep.subr.bf16.mxu0 %v754_v0 }
  0x5b   :  { %578 = vmatprep.subr.bf16.mxu1 %v754_v0  ;;  %p725_p7 = por %p724_p6, %p723_p5 }
  0x5d   :  { %598 = vmatpush3.bf16.msra.mxu0 %v597_v63  ;;  %p726_p8 = pnand %p725_p7, %p719_p4 }
  0x5e   :  { %580 = vmatpush3.bf16.msra.mxu1 %v579_v25  ;;  %599 = vmatprep.subr.bf16.mxu0 %v754_v0 }
  0x5f   :  { %581 = vmatprep.subr.bf16.mxu1 %v754_v0 }
  0x61   :  { %601 = vmatpush3.bf16.msra.mxu0 %v600_v3 }
  0x62   :  { %583 = vmatpush3.bf16.msra.mxu1 %v582_v28  ;;  %602 = vmatprep.subr.bf16.mxu0 %v754_v0 }
  0x63   :  { %584 = vmatprep.subr.bf16.mxu1 %v754_v0 }
  0x65   :  { %604 = vmatpush3.bf16.msra.mxu0 %v603_v6 }
  0x66   :  { %586 = vmatpush3.bf16.msra.mxu1 %v585_v31  ;;  %605 = vmatprep.subr.bf16.mxu0 %v754_v0 }
  0x67   :  { %587 = vmatprep.subr.bf16.mxu1 %v754_v0 }
  0x6a   :  { %589 = vmatpush3.bf16.msra.mxu1 %v588_v34 }
 0x123   :  { %v172_v10 = vpop.f32.mrb[0].mxu0 }
 0x124   :  { %v173_v11 = vadd.f32 %v441_v9, %v172_v10  ;;  %v492_v12 = vpop.f32.mrb[1].mxu0  ;;  %v606_v9 = vpack.c.bf16 %v340_v8, %v339_v7  ;;  %v341_v10 = vld [vmem:[#allocation8 + $0x60] sm:$0xff] }
 0x126   :  { %178 = vadd.xlane.f32.xlu0 %v173_v11  ;;  %v180_v13 = vmul.f32 %v173_v11, %v173_v11  ;;  %607 = vmatpush3.bf16.msra.mxu0 %v606_v9 }
 0x127   :  { %608 = vmatprep.subr.bf16.mxu0 %v754_v0 }
 0x12a   :  { %181 = vadd.xlane.f32.xlu0 %v180_v13  ;;  %v343_v13 = vld [vmem:[#allocation8 + $0x70] sm:$0xff] }
 0x12b   :  { %v612_v15 = vpack.c.bf16 %v344_v14, %v343_v13 }
 0x1b3   :  { %v179_v35 = vpop.xlane.xlu0 %178 }
 0x1b4   :  { %v183_v36 = vmul.f32 0.015625, %v179_v35 }
 0x1b6   :  { %v185_v38 = vmul.f32 %v183_v36, %v183_v36  ;;  %v196_v44 = vsub.f32 %v173_v11, %v183_v36  ;;  %v342_v11 = vld [vmem:[#allocation8 + $0x68] sm:$0xff] }
 0x1b7   :  { %v182_v37 = vpop.xlane.xlu0 %181  ;;  %v609_v12 = vpack.c.bf16 %v342_v11, %v341_v10 }
 0x1b8   :  { %v184_v39 = vmul.f32 0.015625, %v182_v37 }
 0x1b9   :  { %610 = vmatpush3.bf16.msra.mxu0 %v609_v12 }
 0x1ba   :  { %v186_v40 = vsub.f32 %v184_v39, %v185_v38  ;;  %611 = vmatprep.subr.bf16.mxu0 %v754_v0  ;;  %v447_v0 = vld [vmem:[%s933_s8] ss:$0 sm:$0xff] }
 0x1bc   :  { %v187_v41 = vadd.f32 1e-05, %v186_v40 }
 0x1bd   :  { %613 = vmatpush3.bf16.msra.mxu0 %v612_v15 }
 0x1be   :  { %624 = vrsqrt.f32 %v187_v41 }
 0x1c8   :  { %v625_v43 = vpop.eup %624 }
 0x1c9   :  { %v195_v45 = vmul.f32 %v625_v43, %v443_v42 }
 0x1cb   :  { %v197_v47 = vmul.f32 %v196_v44, %v195_v45 }
 0x1cd   :  { %v204_v48 = vadd.f32 %v444_v46, %v197_v47 }
 0x1cf   :  { %v205_v49 = vmax.f32 %v204_v48, 0.0 }
 0x1d1   :  { %526 = vmatmul.mubr.f32.vlgmr.msra.gmra.mrb[0].mxu1 %v205_v49 }
 0x2a4   :  { %v295_v54 = vpop.f32.mrb[0].mxu1 }
 0x2a5   :  { %v296_v55 = vadd.f32 %v445_v53, %v295_v54  ;;  %v527_v56 = vpop.f32.mrb[1].mxu1 }
 0x2a7   :  { %301 = vadd.xlane.f32.xlu1 %v296_v55  ;;  %v303_v57 = vmul.f32 %v296_v55, %v296_v55 }
 0x2ab   :  { %304 = vadd.xlane.f32.xlu1 %v303_v57 }
 0x334   :  { %v302_v16 = vpop.xlane.xlu1 %301 }
 0x335   :  { %v306_v17 = vmul.f32 0.03125, %v302_v16 }
 0x337   :  { %v308_v19 = vmul.f32 %v306_v17, %v306_v17  ;;  %v319_v25 = vsub.f32 %v296_v55, %v306_v17 }
 0x338   :  { %v305_v18 = vpop.xlane.xlu1 %304 }
 0x339   :  { %v307_v20 = vmul.f32 0.03125, %v305_v18 }
 0x33b   :  { %v309_v21 = vsub.f32 %v307_v20, %v308_v19 }
 0x33d   :  { %v310_v22 = vadd.f32 1e-05, %v309_v21 }
 0x33f   :  { %626 = vrsqrt.f32 %v310_v22 }
 0x349   :  { %v627_v24 = vpop.eup %626 }
 0x34a   :  { %v318_v26 = vmul.f32 %v627_v24, %v446_v23 }
 0x34c   :  { %v320_v27 = vmul.f32 %v319_v25, %v318_v26 }
 0x34e   :  { %v327_v28 = vadd.f32 %v447_v0, %v320_v27 }
 0x350   :  { %v328_v29 = vmax.f32 %v327_v28, 0.0 }
 0x352   :  { %561 = vmatmul.mubr.f32.vlgmr.msra.gmra.mrb[2].mxu0 %v328_v29 }
 0x425   :  { %v418_v31 = vpop.f32.mrb[2].mxu0 }
 0x426   :  { %v419_v32 = vadd.f32 %v448_v30, %v418_v31  ;;  %v562_v33 = vpop.f32.mrb[3].mxu0 }
 0x428   :  { %628 = vtanh.f32 %v419_v32 }
 0x432   :  { %v629_v34 = vpop.eup %628 }
 0x433   :  { %423 = vst [vmem:[#allocation10] sm:$0xff] %v629_v34 }
 0x434   :  { %729 = shalt.err (!%p726_p8)
}
 0x435   :  { %s730_s10 = scalar_lea.hbm %s936_s11, 128 }
 0x436   :  { %p731_p9 = scmp.ne.s32.totalorder %s936_s11, %s730_s10  ;;  %p734_p10 = scmp.lt.u32.totalorder %s730_s10, %s936_s11 }
 0x438   :  { %p736_p11 = pnand %p734_p10, %p731_p9 }
 0x43a   :  { %739 = shalt.err (!%p736_p11)
}
 0x43b   :  { %433 = dma.vmem_to_hbm [thread:$0]  %s431_s13, 128, %s936_s11, [#allocation4]  }
 0x43c   :  { %746 = dma.done.wait [#allocation4], 128  }
 0x43d   :  { %747 = vsyncadd [#allocation4], 4294967168 }
 0x43e   :  { %437 = vsyncpa [#allocation3], 1 }
 0x43f   :  { %438 = vsyncpa [#allocation6], 1 }
 0x440   :  { %439 = vsyncpa [#allocation9], 1 }
 0x441   :  { %440 = vsyncpa [#allocation4], 1 }

</bundles_post_ra>
